<compile_context>
chip_gen: v5e
topology: v5e:2x2
jax: 0.10.0
libtpu: 0.0.40
codegen_flags: <defaults>
</compile_context>

<pallas_src>
import functools

import numpy as np

import jax
import jax.numpy as jnp
from jax.experimental import pallas as pl
from jax.experimental.pallas import tpu as pltpu


def _round_up(v, m):
    return ((v + m - 1) // m) * m


def _cdiv(a, b):
    return (a + b - 1) // b


def _vmem_capacity_bytes():
    """Physical VMEM of the current chip; conservative v7x (64 MiB) fallback."""
    try:
        info = pltpu.get_tpu_info()
        for name in ("vmem_capacity_bytes", "vmem_bytes", "vmem_size_bytes"):
            v = getattr(info, name, None)
            if v:
                return int(v)
    except Exception:
        pass
    return 64 * 1024 * 1024


def _focal_kernel(logit_ref, target_ref, out_ref, *,
                  smooth, gamma, num_class, alpha_vals,
                  hw, rt, num_j, need_mask, accumulate):
    j = pl.program_id(2)

    if accumulate:
        # Output block is resident across the (arbitrary) inner axis.
        @pl.when(j == 0)
        def _():
            out_ref[...] = jnp.zeros_like(out_ref)

    x = logit_ref[...].astype(jnp.float32)        # (bn, C, rt, 128)
    t = target_ref[...].astype(jnp.int32)         # (bn, rt, 128)
    shape = t.shape

    # Class reduction over the *major* C axis: plain elementwise adds/selects
    # on full-occupancy (rt, 128) vregs (no XLU sublane reduce, no big mask).
    x_t = jnp.zeros(shape, jnp.float32)
    sum_x = jnp.zeros(shape, jnp.float32)
    alpha_t = jnp.zeros(shape, jnp.float32) if alpha_vals is not None else None
    for c in range(num_class):
        xc = x[:, c]                              # tile-aligned major-axis slice
        sel = t == c
        sum_x = sum_x + xc
        x_t = x_t + jnp.where(sel, xc, 0.0)
        if alpha_vals is not None:
            alpha_t = alpha_t + jnp.where(sel, alpha_vals[c], 0.0)

    # Closed form of clamp(one_hot, smooth/(C-1), 1-smooth) followed by
    # pt = sum(one_hot_s * logit, axis=class) + smooth.
    b = smooth / (num_class - 1) if num_class > 1 else 0.0
    a = 1.0 - smooth - b
    pt = a * x_t + b * sum_x + smooth

    if need_mask:
        # Force pt -> 1 on padded / out-of-range positions BEFORE log/pow so
        # their contribution is exactly 0 and garbage lanes can't emit NaN/Inf.
        p = pl.program_id(1)
        block_rb = p * num_j + j                  # un-clamped row-block index
        row = jax.lax.broadcasted_iota(jnp.int32, shape, len(shape) - 2)
        lane = jax.lax.broadcasted_iota(jnp.int32, shape, len(shape) - 1)
        gpos = (block_rb * rt + row) * 128 + lane
        pt = jnp.where(gpos < hw, pt, 1.0)

    logpt = jnp.log(pt)
    one_minus_pt = 1.0 - pt

    # Integer-gamma fast path: repeated multiply instead of pow = exp(g*log).
    if float(gamma).is_integer() and 0 <= int(gamma) <= 8:
        focal = jnp.ones_like(pt)
        for _ in range(int(gamma)):
            focal = focal * one_minus_pt
    else:
        # Matches torch.pow semantics (NaN possible if pt slightly > 1).
        focal = jnp.power(one_minus_pt, gamma)

    loss = focal * logpt
    if alpha_vals is not None:
        loss = alpha_t * loss
    loss = -loss

    if accumulate:
        out_ref[...] += loss[None]                # (1, bn, rt, 128)
    else:
        out_ref[...] = loss                       # (bn, rt, 128) per-pixel loss


def focal_loss_pallas(logit, target, *, apply_nonlin=None, alpha=None,
                      gamma=2.0, balance_index=0, smooth=1e-5,
                      size_average=True):
    """Replicates FocalLoss.forward (probabilities in, scalar mean loss out)."""
    if smooth is not None and (smooth < 0 or smooth > 1.0):
        raise ValueError('smooth value should be in [0,1]')
    if apply_nonlin is not None:
        logit = apply_nonlin(logit)

    n = int(logit.shape[0])
    c = int(logit.shape[1])
    hw = 1
    for d in logit.shape[2:]:
        hw *= int(d)

    # alpha -> compile-time per-class constants (no extra input tensor).
    if alpha is None:
        alpha_vals = None                         # all-ones: multiply elided
    elif isinstance(alpha, (float, int)):
        av = [1.0 - float(alpha)] * c
        av[balance_index] = float(alpha)
        alpha_vals = tuple(av)
    else:
        av = np.asarray(alpha, dtype=np.float64).reshape(-1)
        assert av.shape[0] == c
        av = av / av.sum()
        alpha_vals = tuple(float(v) for v in av)

    # Layout: (N, C, HW) -> (N, C, R, 128); targets (N, HW) -> (N, R, 128).
    logit3 = jnp.reshape(logit, (n, c, hw))
    tgt = jnp.reshape(target, (n, hw))
    if not jnp.issubdtype(tgt.dtype, jnp.integer):
        tgt = tgt.astype(jnp.int32)               # int8/int32 kept as-is (cast in kernel)

    hw_pad = _round_up(hw, 128)
    if hw_pad != hw:
        # Only hit when H*W % 128 != 0; costs one extra HBM pass.
        logit3 = jnp.pad(logit3, ((0, 0), (0, 0), (0, hw_pad - hw)))
        tgt = jnp.pad(tgt, ((0, 0), (0, hw_pad - hw)))
    r = hw_pad // 128
    logit4 = jnp.reshape(logit3, (n, c, r, 128))
    tgt3 = jnp.reshape(tgt, (n, r, 128))

    # --- VMEM-budget-driven tile sizing (generation aware) ------------------
    cap = _vmem_capacity_bytes()
    budget = max(8 << 20, min(cap // 2 - (8 << 20), 48 << 20))
    x_isz = jnp.dtype(logit4.dtype).itemsize
    t_isz = 4                                     # conservative upper bound

    def _block_bytes(bn_, rt_):
        rtp_x = _round_up(rt_, max(8, 32 // x_isz))   # dtype-aware sublane pad
        rtp = _round_up(rt_, 8)
        lg = 2 * bn_ * c * rtp_x * 128 * x_isz        # double-buffered logits
        tg = 2 * bn_ * rtp * 128 * t_isz              # double-buffered targets
        ot = 2 * bn_ * rtp * 128 * 4                  # output (assume 2 bufs)
        return lg + tg + ot

    rt_cap = 2048                                 # ~256K lanes per block max
    bn = 1
    if r <= rt_cap and _block_bytes(1, r) <= budget:
        rt = r                                    # whole image rows in one block
        for cand in range(n, 0, -1):              # fold batch rows (small HW)
            if n % cand == 0 and _block_bytes(cand, r) <= budget:
                bn = cand
                break
    else:
        per8 = _block_bytes(1, 8)
        rt = max(8, min((budget // per8) * 8, (r // 8) * 8, rt_cap))

    num_nb = n // bn
    total_rb = _cdiv(r, rt)

    # Megacore (v7x) path: split HW row-tiles across an outer parallel axis so
    # both TensorCores stay busy even when N is small; harmless on 1-TC chips.
    p_split = 2 if (size_average and total_rb >= 2) else 1
    num_j = _cdiv(total_rb, p_split)
    oob = p_split * num_j > total_rb
    need_mask = (p_split * num_j * rt * 128) != hw

    def _row_block(p, j):
        rb = p * num_j + j
        if oob:
            # Clamp for the (rare) duplicated tail step; the kernel's position
            # mask zeroes its contribution (its un-clamped positions >= hw).
            rb = jnp.minimum(rb, total_rb - 1)
        return rb

    lg_spec = pl.BlockSpec((bn, c, rt, 128),
                           lambda ni, p, j: (ni, 0, _row_block(p, j), 0))
    tg_spec = pl.BlockSpec((bn, rt, 128),
                           lambda ni, p, j: (ni, _row_block(p, j), 0))

    kernel = functools.partial(
        _focal_kernel,
        smooth=float(smooth) if smooth else 0.0,
        gamma=float(gamma), num_class=c, alpha_vals=alpha_vals,
        hw=hw, rt=rt, num_j=num_j, need_mask=need_mask,
        accumulate=size_average)

    est = _block_bytes(bn, rt)
    vmem_limit = int(min(cap - (4 << 20), est + (8 << 20)))
    cparams = pltpu.CompilerParams(
        dimension_semantics=("parallel", "parallel", "arbitrary"),
        vmem_limit_bytes=vmem_limit)

    if size_average:
        # Resident, sublane+lane dense partial-loss blocks per (batch-block, p).
        partials = pl.pallas_call(
            kernel,
            out_shape=jax.ShapeDtypeStruct((num_nb * p_split, bn, rt, 128),
                                           jnp.float32),
            grid_spec=pltpu.PrefetchScalarGridSpec(
                num_scalar_prefetch=0,
                grid=(num_nb, p_split, num_j),
                in_specs=[lg_spec, tg_spec],
                out_specs=pl.BlockSpec(
                    (1, bn, rt, 128),
                    lambda ni, p, j: (ni * p_split + p, 0, 0, 0)),
            ),
            compiler_params=cparams,
        )(logit4, tgt3)
        return jnp.sum(partials) / (n * hw)

    # size_average=False: emit the un-reduced per-element loss (torch shape
    # (N*HW,)). p_split == 1 here, so every output block is written exactly once.
    loss_map = pl.pallas_call(
        kernel,
        out_shape=jax.ShapeDtypeStruct((n, r, 128), jnp.float32),
        grid_spec=pltpu.PrefetchScalarGridSpec(
            num_scalar_prefetch=0,
            grid=(num_nb, p_split, num_j),
            in_specs=[lg_spec, tg_spec],
            out_specs=pl.BlockSpec((bn, rt, 128),
                                   lambda ni, p, j: (ni, _row_block(p, j), 0)),
        ),
        compiler_params=cparams,
    )(logit4, tgt3)
    return loss_map.reshape(n, hw_pad)[:, :hw].reshape(-1)


def focal_loss_ref(logit_nchw, target, *, gamma=2.0, smooth=1e-5):
    """Plain-JAX reference of the same math (alpha=None, size_average=True)."""
    n, c, h, w = logit_nchw.shape
    logit2d = jnp.transpose(logit_nchw, (0, 2, 3, 1)).reshape(-1, c)
    tgt = jnp.reshape(target, (-1,)).astype(jnp.int32)
    one_hot = jax.nn.one_hot(tgt, c, dtype=jnp.float32)
    one_hot_s = jnp.clip(one_hot, smooth / (c - 1), 1.0 - smooth)
    pt = jnp.sum(one_hot_s * logit2d, axis=1) + smooth
    logpt = jnp.log(pt)
    alpha_row = jnp.ones_like(pt)                 # alpha = ones(C,1); alpha[idx] = 1
    loss = -1.0 * alpha_row * jnp.power(1.0 - pt, gamma) * logpt
    return jnp.mean(loss)


if __name__ == "__main__":
    key = jax.random.PRNGKey(0)
    k1, k2 = jax.random.split(key)

    N, C, H, W = 2, 4, 16, 16
    # Module assumes probabilities when apply_nonlin is None; feed softmax'd logits.
    raw = jax.random.normal(k1, (N, C, H, W), jnp.float32)
    probs = jax.nn.softmax(raw, axis=1)
    target = jax.random.randint(k2, (N, 1, H, W), 0, C, jnp.int32)

    loss = focal_loss_pallas(probs, target)
    loss = jax.block_until_ready(loss)

    ref = focal_loss_ref(probs, target)
    assert jnp.allclose(loss, ref, rtol=1e-5, atol=1e-6), (loss, ref)

    print("KERNEL_OK")
</pallas_src>

<mosaic_0001>
module attributes {stable_mosaic.version = 11 : i64} {
  func.func @_focal_kernel(%arg0: i32, %arg1: i32, %arg2: i32, %arg3: memref<2x4x2x128xf32, #tpu.memory_space<vmem>>, %arg4: memref<2x2x128xi32, #tpu.memory_space<vmem>>, %arg5: memref<1x2x2x128xf32, #tpu.memory_space<vmem>>) attributes {dimension_semantics = [#tpu.dimension_semantics<parallel>, #tpu.dimension_semantics<parallel>, #tpu.dimension_semantics<arbitrary>], iteration_bounds = array<i64: 1, 1, 1>, scalar_prefetch = 0 : i64, scratch_operands = 0 : i64, tpu.core_type = #tpu.core_type<tc>, window_params = [{transform_indices = @transform_0, window_bounds = array<i64: 2, 4, 2, 128>}, {transform_indices = @transform_1, window_bounds = array<i64: 2, 2, 128>}, {transform_indices = @transform_2, window_bounds = array<i64: 1, 2, 2, 128>}]} {
    %c0_i32 = arith.constant 0 : i32
    %0 = arith.cmpi eq, %arg2, %c0_i32 : i32
    %1 = arith.extui %0 : i1 to i32
    %c0_i32_0 = arith.constant 0 : i32
    %2 = arith.cmpi ne, %1, %c0_i32_0 : i32
    scf.if %2 {
      %cst_27 = arith.constant 0.000000e+00 : f32
      %59 = vector.broadcast %cst_27 : f32 to vector<1x2x2x128xf32>
      %c0_28 = arith.constant 0 : index
      %c0_29 = arith.constant 0 : index
      %c0_30 = arith.constant 0 : index
      %c0_31 = arith.constant 0 : index
      %60 = vector.load %arg5[%c0_28, %c0_29, %c0_30, %c0_31] : memref<1x2x2x128xf32, #tpu.memory_space<vmem>>, vector<1x2x2x128xf32>
      tpu.vector_store %arg5[%c0_28, %c0_29, %c0_30, %c0_31], %59 {strides = array<i32>} : memref<1x2x2x128xf32, #tpu.memory_space<vmem>>, vector<1x2x2x128xf32>,
    } else {
    }
    %c0 = arith.constant 0 : index
    %c0_1 = arith.constant 0 : index
    %c0_2 = arith.constant 0 : index
    %c0_3 = arith.constant 0 : index
    %3 = vector.load %arg3[%c0, %c0_1, %c0_2, %c0_3] : memref<2x4x2x128xf32, #tpu.memory_space<vmem>>, vector<2x4x2x128xf32>
    %c0_4 = arith.constant 0 : index
    %c0_5 = arith.constant 0 : index
    %c0_6 = arith.constant 0 : index
    %4 = vector.load %arg4[%c0_4, %c0_5, %c0_6] : memref<2x2x128xi32, #tpu.memory_space<vmem>>, vector<2x2x128xi32>
    %cst = arith.constant 0.000000e+00 : f32
    %5 = vector.broadcast %cst : f32 to vector<2x2x128xf32>
    %cst_7 = arith.constant 0.000000e+00 : f32
    %6 = vector.broadcast %cst_7 : f32 to vector<2x2x128xf32>
    %7 = vector.extract_strided_slice %3 {offsets = [0, 0, 0, 0], sizes = [2, 1, 2, 128], strides = [1, 1, 1, 1]} : vector<2x4x2x128xf32> to vector<2x1x2x128xf32>
    %8 = vector.shape_cast %7 : vector<2x1x2x128xf32> to vector<2x2x128xf32>
    %c0_i32_8 = arith.constant 0 : i32
    %9 = vector.broadcast %c0_i32_8 : i32 to vector<2x2x128xi32>
    %10 = arith.cmpi eq, %4, %9 : vector<2x2x128xi32>
    %11 = arith.addf %6, %8 : vector<2x2x128xf32>
    %cst_9 = arith.constant 0.000000e+00 : f32
    %12 = vector.broadcast %cst_9 : f32 to vector<2x2x128xf32>
    %13 = arith.select %10, %8, %12 : vector<2x2x128xi1>, vector<2x2x128xf32>
    %14 = arith.addf %5, %13 : vector<2x2x128xf32>
    %15 = vector.extract_strided_slice %3 {offsets = [0, 1, 0, 0], sizes = [2, 1, 2, 128], strides = [1, 1, 1, 1]} : vector<2x4x2x128xf32> to vector<2x1x2x128xf32>
    %16 = vector.shape_cast %15 : vector<2x1x2x128xf32> to vector<2x2x128xf32>
    %c1_i32 = arith.constant 1 : i32
    %17 = vector.broadcast %c1_i32 : i32 to vector<2x2x128xi32>
    %18 = arith.cmpi eq, %4, %17 : vector<2x2x128xi32>
    %19 = arith.addf %11, %16 : vector<2x2x128xf32>
    %cst_10 = arith.constant 0.000000e+00 : f32
    %20 = vector.broadcast %cst_10 : f32 to vector<2x2x128xf32>
    %21 = arith.select %18, %16, %20 : vector<2x2x128xi1>, vector<2x2x128xf32>
    %22 = arith.addf %14, %21 : vector<2x2x128xf32>
    %23 = vector.extract_strided_slice %3 {offsets = [0, 2, 0, 0], sizes = [2, 1, 2, 128], strides = [1, 1, 1, 1]} : vector<2x4x2x128xf32> to vector<2x1x2x128xf32>
    %24 = vector.shape_cast %23 : vector<2x1x2x128xf32> to vector<2x2x128xf32>
    %c2_i32 = arith.constant 2 : i32
    %25 = vector.broadcast %c2_i32 : i32 to vector<2x2x128xi32>
    %26 = arith.cmpi eq, %4, %25 : vector<2x2x128xi32>
    %27 = arith.addf %19, %24 : vector<2x2x128xf32>
    %cst_11 = arith.constant 0.000000e+00 : f32
    %28 = vector.broadcast %cst_11 : f32 to vector<2x2x128xf32>
    %29 = arith.select %26, %24, %28 : vector<2x2x128xi1>, vector<2x2x128xf32>
    %30 = arith.addf %22, %29 : vector<2x2x128xf32>
    %31 = vector.extract_strided_slice %3 {offsets = [0, 3, 0, 0], sizes = [2, 1, 2, 128], strides = [1, 1, 1, 1]} : vector<2x4x2x128xf32> to vector<2x1x2x128xf32>
    %32 = vector.shape_cast %31 : vector<2x1x2x128xf32> to vector<2x2x128xf32>
    %c3_i32 = arith.constant 3 : i32
    %33 = vector.broadcast %c3_i32 : i32 to vector<2x2x128xi32>
    %34 = arith.cmpi eq, %4, %33 : vector<2x2x128xi32>
    %35 = arith.addf %27, %32 : vector<2x2x128xf32>
    %cst_12 = arith.constant 0.000000e+00 : f32
    %36 = vector.broadcast %cst_12 : f32 to vector<2x2x128xf32>
    %37 = arith.select %34, %32, %36 : vector<2x2x128xi1>, vector<2x2x128xf32>
    %38 = arith.addf %30, %37 : vector<2x2x128xf32>
    %cst_13 = arith.constant 0.999986648 : f32
    %39 = vector.broadcast %cst_13 : f32 to vector<2x2x128xf32>
    %40 = arith.mulf %39, %38 : vector<2x2x128xf32>
    %cst_14 = arith.constant 3.33333332E-6 : f32
    %41 = vector.broadcast %cst_14 : f32 to vector<2x2x128xf32>
    %42 = arith.mulf %41, %35 : vector<2x2x128xf32>
    %43 = arith.addf %40, %42 : vector<2x2x128xf32>
    %cst_15 = arith.constant 9.99999974E-6 : f32
    %44 = vector.broadcast %cst_15 : f32 to vector<2x2x128xf32>
    %45 = arith.addf %43, %44 : vector<2x2x128xf32>
    %46 = math.log %45 : vector<2x2x128xf32>
    %cst_16 = arith.constant 1.000000e+00 : f32
    %47 = vector.broadcast %cst_16 : f32 to vector<2x2x128xf32>
    %48 = arith.subf %47, %45 : vector<2x2x128xf32>
    %cst_17 = arith.constant 1.000000e+00 : f32
    %49 = vector.broadcast %cst_17 : f32 to vector<2x2x128xf32>
    %50 = arith.mulf %49, %48 : vector<2x2x128xf32>
    %51 = arith.mulf %50, %48 : vector<2x2x128xf32>
    %52 = arith.mulf %51, %46 : vector<2x2x128xf32>
    %cst_18 = arith.constant 0.000000e+00 : f32
    %53 = vector.broadcast %cst_18 : f32 to vector<2x2x128xf32>
    %54 = arith.subf %53, %52 : vector<2x2x128xf32>
    %c0_19 = arith.constant 0 : index
    %c0_20 = arith.constant 0 : index
    %c0_21 = arith.constant 0 : index
    %c0_22 = arith.constant 0 : index
    %55 = vector.load %arg5[%c0_19, %c0_20, %c0_21, %c0_22] : memref<1x2x2x128xf32, #tpu.memory_space<vmem>>, vector<1x2x2x128xf32>
    %56 = vector.shape_cast %54 : vector<2x2x128xf32> to vector<1x2x2x128xf32>
    %57 = arith.addf %55, %56 : vector<1x2x2x128xf32>
    %c0_23 = arith.constant 0 : index
    %c0_24 = arith.constant 0 : index
    %c0_25 = arith.constant 0 : index
    %c0_26 = arith.constant 0 : index
    %58 = vector.load %arg5[%c0_23, %c0_24, %c0_25, %c0_26] : memref<1x2x2x128xf32, #tpu.memory_space<vmem>>, vector<1x2x2x128xf32>
    tpu.vector_store %arg5[%c0_23, %c0_24, %c0_25, %c0_26], %57 {strides = array<i32>} : memref<1x2x2x128xf32, #tpu.memory_space<vmem>>, vector<1x2x2x128xf32>,
    return
  }
  func.func @transform_0(%arg0: i32, %arg1: i32, %arg2: i32) -> (i32, i32, i32, i32) {
    %c1_i32 = arith.constant 1 : i32
    %0 = arith.muli %arg1, %c1_i32 : i32
    %1 = arith.addi %0, %arg2 : i32
    %c0_i32 = arith.constant 0 : i32
    %c0_i32_0 = arith.constant 0 : i32
    %c0_i32_1 = arith.constant 0 : i32
    return %arg0, %c0_i32, %1, %c0_i32_0 : i32, i32, i32, i32
  }
  func.func @transform_1(%arg0: i32, %arg1: i32, %arg2: i32) -> (i32, i32, i32) {
    %c1_i32 = arith.constant 1 : i32
    %0 = arith.muli %arg1, %c1_i32 : i32
    %1 = arith.addi %0, %arg2 : i32
    %c0_i32 = arith.constant 0 : i32
    %c0_i32_0 = arith.constant 0 : i32
    return %arg0, %1, %c0_i32 : i32, i32, i32
  }
  func.func @transform_2(%arg0: i32, %arg1: i32, %arg2: i32) -> (i32, i32, i32, i32) {
    %c1_i32 = arith.constant 1 : i32
    %0 = arith.muli %arg0, %c1_i32 : i32
    %1 = arith.addi %0, %arg1 : i32
    %c0_i32 = arith.constant 0 : i32
    %c0_i32_0 = arith.constant 0 : i32
    %c0_i32_1 = arith.constant 0 : i32
    %c0_i32_2 = arith.constant 0 : i32
    return %1, %c0_i32, %c0_i32_0, %c0_i32_1 : i32, i32, i32, i32
  }
}

</mosaic_0001>

<bundles_post_ra>
// kernel: tpu_custom_call.1
= control target key start
LH: loop header
LB: loop body
LE: loop exit
PB: predicated region body
PF: predicated region fallthrough
CT: control target
= control target key end

     0   :  { %7 = vsyncpa [#allocation3], 0  ;;  %s278_s0 = inlined_call_operand.hbm [shape: f32[2,4,2,128], index: 0, kind: input, shape index: {}]   ;;  %s279_s1 = inlined_call_operand.hbm [shape: s32[2,2,128], index: 1, kind: input, shape index: {}]   ;;  %s280_s2 = inlined_call_operand.hbm [shape: f32[1,2,2,128], index: 2, kind: output, shape index: {}]  }
   0x1   :  { %8 = vsyncpa [#allocation6], 0 }
   0x2   :  { %9 = vsyncpa [#allocation4], 0  ;;  %s17_s11 = sshll.u32 %s278_s0, 4  ;;  %s239_s12 = smov [#allocation2]   ;;  %s18_s11 = int_to_ptr.hbm [resolvable:$true] %s17_s11 }
   0x3   :  { %s19_s13 = sshll.u32 %s239_s12, 4  ;;  %s33_s16 = sshll.u32 %s279_s1, 4  ;;  %s20_s13 = int_to_ptr.vmem [resolvable:$true] %s19_s13  ;;  %s34_s16 = int_to_ptr.hbm [resolvable:$true] %s33_s16 }
   0x4   :  { %s240_s17 = smov 32   ;;  %s241_s18 = smov 2  }
   0x5   :  { %25 = dma.hbm_to_vmem [thread:$0]  %s18_s11, 256, %s20_s13, [#allocation3], %s240_s17, %s240_s17, %s241_s18  }
   0x6   :  { %s242_s19 = smov [#allocation5]  }
   0x7   :  { %s35_s20 = sshll.u32 %s242_s19, 4  ;;  %s36_s20 = int_to_ptr.vmem [resolvable:$true] %s35_s20 }
   0x8   :  { %41 = dma.hbm_to_vmem [thread:$0]  %s34_s16, 64, %s36_s20, [#allocation6], %s240_s17, %s240_s17, %s241_s18  }
   0x9   :  { %233 = dma.done.wait [#allocation3], 256  }
   0xa   :  { %234 = vsyncadd [#allocation3], 4294967040 }
   0xb   :  { %235 = dma.done.wait [#allocation6], 64  }
   0xc   :  { %236 = vsyncadd [#allocation6], 4294967232  ;;  %v243_v0 = vmov 0.0   ;;  %v59_v1 = vld [vmem:[#allocation2] sm:$0x3]  ;;  %s244_s0 = smov [#allocation7]  }
   0xd   :  { %57 = vst [vmem:[#allocation7] sm:$0x3] %v243_v0  ;;  %v60_v2 = vld [vmem:[#allocation2 + $0x2] sm:$0x3]  ;;  %v61_v3 = vld [vmem:[#allocation2 + $0x4] sm:$0x3] }
   0xe   :  { %58 = vst [vmem:[#allocation7 + $0x2] sm:$0x3] %v243_v0  ;;  %v62_v4 = vld [vmem:[#allocation2 + $0x6] sm:$0x3]  ;;  %v67_v5 = vld [vmem:[#allocation5] sm:$0x3]  ;;  %v79_v6 = vadd.f32 %v60_v2, %v59_v1 }
   0xf   :  { %vm69_vm0 = vcmp.eq.s32.totalorder %v67_v5, 0  ;;  %vm77_vm1 = vcmp.eq.s32.totalorder %v67_v5, 1  ;;  %vm85_vm2 = vcmp.eq.s32.totalorder %v67_v5, 2  ;;  %vm93_vm3 = vcmp.eq.s32.totalorder %v67_v5, 3  ;;  %v63_v7 = vld [vmem:[#allocation2 + $0x8] sm:$0x3] }
  0x10   :  { %v73_v8 = vsel %vm69_vm0, %v59_v1, 0.0  ;;  %v81_v9 = vsel %vm77_vm1, %v60_v2, 0.0  ;;  %v87_v10 = vadd.f32 %v79_v6, %v61_v3  ;;  %v89_v11 = vsel %vm85_vm2, %v61_v3, 0.0  ;;  %v64_v12 = vld [vmem:[#allocation2 + $0xa] sm:$0x3]  ;;  %s135_s1 = sshll.u32 %s244_s0, 4  ;;  %s136_s1 = int_to_ptr.vmem [resolvable:$true] %s135_s1 }
  0x11   :  { %v83_v13 = vadd.f32 %v81_v9, %v73_v8  ;;  %v65_v14 = vld [vmem:[#allocation2 + $0xc] sm:$0x3]  ;;  %v80_v15 = vadd.f32 %v64_v12, %v63_v7  ;;  %v97_v17 = vsel %vm93_vm3, %v62_v4, 0.0  ;;  %v68_v18 = vld [vmem:[#allocation5 + $0x2] sm:$0x3]  ;;  %s137_s23 = sshll.u32 %s280_s2, 4  ;;  %s138_s23 = int_to_ptr.hbm [resolvable:$true] %s137_s23 }
  0x12   :  { %v95_v16 = vadd.f32 %v87_v10, %v62_v4  ;;  %v66_v20 = vld [vmem:[#allocation2 + $0xe] sm:$0x3]  ;;  %vm70_vm4 = vcmp.eq.s32.totalorder %v68_v18, 0  ;;  %vm78_vm5 = vcmp.eq.s32.totalorder %v68_v18, 1  ;;  %vm86_vm6 = vcmp.eq.s32.totalorder %v68_v18, 2 }
  0x13   :  { %v91_v19 = vadd.f32 %v89_v11, %v83_v13  ;;  %v74_v22 = vsel %vm70_vm4, %v63_v7, 0.0  ;;  %v82_v23 = vsel %vm78_vm5, %v64_v12, 0.0  ;;  %v88_v24 = vadd.f32 %v80_v15, %v65_v14 }
  0x14   :  { %v103_v21 = vmul.f32 3.3333333e-06, %v95_v16  ;;  %v84_v26 = vadd.f32 %v82_v23, %v74_v22  ;;  %v90_v27 = vsel %vm86_vm6, %v65_v14, 0.0  ;;  %vm94_vm7 = vcmp.eq.s32.totalorder %v68_v18, 3  ;;  %v121_v47 = vld [vmem:[#allocation7] sm:$0x3] }
  0x15   :  { %v99_v25 = vadd.f32 %v97_v17, %v91_v19  ;;  %v96_v28 = vadd.f32 %v88_v24, %v66_v20  ;;  %v98_v29 = vsel %vm94_vm7, %v66_v20, 0.0  ;;  %v122_v52 = vld [vmem:[#allocation7 + $0x2] sm:$0x3] }
  0x16   :  { %v92_v31 = vadd.f32 %v90_v27, %v84_v26 }
  0x17   :  { %v101_v30 = vmul.f32 0.99998665, %v99_v25  ;;  %v104_v34 = vmul.f32 3.3333333e-06, %v96_v28 }
  0x18   :  { %v100_v33 = vadd.f32 %v98_v29, %v92_v31 }
  0x19   :  { %v105_v32 = vadd.f32 %v103_v21, %v101_v30 }
  0x1a   :  { %v102_v36 = vmul.f32 0.99998665, %v100_v33 }
  0x1b   :  { %v107_v35 = vadd.f32 1e-05, %v105_v32 }
  0x1c   :  { %v106_v37 = vadd.f32 %v104_v34, %v102_v36 }
  0x1d   :  { %157 = vlog2.f32 %v107_v35  ;;  %v113_v38 = vsub.f32 1.0, %v107_v35 }
  0x1e   :  { %v108_v39 = vadd.f32 1e-05, %v106_v37 }
  0x1f   :  { %v115_v40 = vmul.f32 %v113_v38, %v113_v38 }
  0x20   :  { %159 = vlog2.f32 %v108_v39  ;;  %v114_v41 = vsub.f32 1.0, %v108_v39 }
  0x22   :  { %v116_v45 = vmul.f32 %v114_v41, %v114_v41 }
  0x23   :  { %v158_v42 = vpop.eup %157 }
  0x24   :  { %v110_v43 = vmul.f32 0.6931472, %v158_v42 }
  0x26   :  { %v117_v44 = vmul.f32 %v115_v40, %v110_v43  ;;  %v160_v46 = vpop.eup %159 }
  0x27   :  { %v112_v49 = vmul.f32 0.6931472, %v160_v46 }
  0x28   :  { %v119_v48 = vsub.f32 0.0, %v117_v44 }
  0x29   :  { %v118_v51 = vmul.f32 %v116_v45, %v112_v49 }
  0x2a   :  { %v123_v50 = vadd.f32 %v121_v47, %v119_v48 }
  0x2b   :  { %v120_v53 = vsub.f32 0.0, %v118_v51 }
  0x2c   :  { %125 = vst [vmem:[#allocation7] sm:$0x3] %v123_v50 }
  0x2d   :  { %v124_v54 = vadd.f32 %v122_v52, %v120_v53 }
  0x2f   :  { %126 = vst [vmem:[#allocation7 + $0x2] sm:$0x3] %v124_v54 }
  0x30   :  { %143 = dma.vmem_to_hbm [thread:$0]  %s136_s1, 64, %s138_s23, [#allocation4], %s240_s17, %s240_s17, %s241_s18  }
  0x31   :  { %237 = dma.done.wait [#allocation4], 64  }
  0x32   :  { %238 = vsyncadd [#allocation4], 4294967232 }
  0x33   :  { %148 = vsyncpa [#allocation3], 1 }
  0x34   :  { %149 = vsyncpa [#allocation6], 1 }
  0x35   :  { %150 = vsyncpa [#allocation4], 1 }

</bundles_post_ra>
